<compile_context>
chip_gen: v7x
topology: tpu7x:2x2x1
jax: 0.10.0
libtpu: 0.0.40
codegen_flags: <defaults>
</compile_context>

<pallas_src>
import functools
import math
from collections import namedtuple

import jax
import jax.numpy as jnp
from jax.experimental import pallas as pl
from jax.experimental.pallas import tpu as pltpu


# ------------------------------- tiling plan ----------------------------------

def _m_plan(M, tmax=2048):
    """Lane (M) tile plan -> (padded_M, tile).

    Tiles are multiples of 128 (unmasked stores) and we aim for >= 2 tiles so the
    single "parallel" grid axis can shard across the two TensorCores on v7x.
    """
    if M <= 128:
        return 128, 128
    n = max(2, -(-M // tmax))                      # ceil-div, at least two tiles
    tm = ((-(-M // n) + 127) // 128) * 128
    return n * tm, tm


def _pad_lanes(a, Mp):
    M = a.shape[-1]
    if Mp == M:
        return a
    pad = [(0, 0)] * (a.ndim - 1) + [(0, Mp - M)]
    return jnp.pad(a, pad)


# ------------------------------ Pallas kernels -------------------------------

def _make_mm_kernel(has_res):
    """out(Cout,TM) = wT(Cout,K) @ a(K,TM), then *scale + shift (+ residual)."""
    def kernel(a_ref, w_ref, s_ref, t_ref, *rest):
        if has_res:
            r_ref, o_ref = rest
        else:
            (o_ref,) = rest
            r_ref = None
        y = jnp.dot(w_ref[...], a_ref[...], preferred_element_type=jnp.float32)
        y = y * s_ref[...] + t_ref[...]
        if r_ref is not None:
            y = y + r_ref[...]
        o_ref[...] = y.astype(o_ref.dtype)
    return kernel


def _make_dwpw_kernel(kk, relu_in, has_res):
    """Fused [ReLU ->] depthwise (kk taps, f32) -> 1x1 pointwise (MXU) -> BN (+res)."""
    def kernel(p_ref, dw_ref, w_ref, s_ref, t_ref, *rest):
        if has_res:
            r_ref, o_ref = rest
        else:
            (o_ref,) = rest
            r_ref = None

        def tap(t):
            v = p_ref[t]                                   # (Cin, TM) f32
            return jnp.maximum(v, 0.0) if relu_in else v

        acc = tap(0) * dw_ref[0]
        for t in range(1, kk):
            acc = acc + tap(t) * dw_ref[t]
        y = jnp.dot(w_ref[...], acc.astype(jnp.bfloat16),
                    preferred_element_type=jnp.float32)    # (Cout, TM)
        y = y * s_ref[...] + t_ref[...]
        if r_ref is not None:
            y = y + r_ref[...]
        o_ref[...] = y.astype(o_ref.dtype)
    return kernel


def _make_max_kernel(kk):
    def kernel(p_ref, o_ref):
        acc = p_ref[0]
        for t in range(1, kk):
            acc = jnp.maximum(acc, p_ref[t])
        o_ref[...] = acc
    return kernel


def _make_avg_kernel(kk):
    def kernel(p_ref, inv_ref, o_ref):
        acc = p_ref[0]
        for t in range(1, kk):
            acc = acc + p_ref[t]
        o_ref[...] = acc * inv_ref[...]                    # count_include_pad=False divisor
    return kernel


def _add_kernel(x_ref, y_ref, o_ref):
    o_ref[...] = x_ref[...] + y_ref[...]


def _head_kernel(x_ref, mm_ref, w_ref, b_ref, o_ref):
    # global average pool as a matmul against a block-mean matrix, then the FC layer.
    gap = jnp.dot(x_ref[...], mm_ref[...], preferred_element_type=jnp.float32)   # (C, N)
    y = jnp.dot(w_ref[...], gap.astype(jnp.bfloat16),
                preferred_element_type=jnp.float32)                              # (nc, N)
    o_ref[...] = y + b_ref[...]


# ------------------------------ Pallas wrappers -------------------------------

def _mm_bn(a, wT, scale, shift, residual):
    """a (K, M) bf16, wT (Cout, K) -> (Cout, M) f32 with fused BN affine (+residual)."""
    K, M = a.shape
    Cout = wT.shape[0]
    Mp, TM = _m_plan(M)
    a = _pad_lanes(a, Mp)
    res = None if residual is None else _pad_lanes(residual, Mp)
    nM = Mp // TM
    s2 = scale.reshape(Cout, 1).astype(jnp.float32)
    t2 = shift.reshape(Cout, 1).astype(jnp.float32)

    in_specs = [pl.BlockSpec((K, TM), lambda i: (0, i)),
                pl.BlockSpec((Cout, K), lambda i: (0, 0)),      # resident weight block
                pl.BlockSpec((Cout, 1), lambda i: (0, 0)),
                pl.BlockSpec((Cout, 1), lambda i: (0, 0))]
    args = [a, wT.astype(jnp.bfloat16), s2, t2]
    if res is not None:
        in_specs.append(pl.BlockSpec((Cout, TM), lambda i: (0, i)))
        args.append(res)

    out = pl.pallas_call(
        _make_mm_kernel(res is not None),
        out_shape=jax.ShapeDtypeStruct((Cout, Mp), jnp.float32),
        grid=(nM,),
        in_specs=in_specs,
        out_specs=pl.BlockSpec((Cout, TM), lambda i: (0, i)),
        compiler_params=pltpu.CompilerParams(dimension_semantics=("parallel",)),
    )(*args)
    return out[:, :M]


def _extract_patches(x, k, stride, padding, dilation=1, pad_value=0.0):
    """x (C, N, H, W) -> ((k*k, C, N, Ho, Wo), Ho, Wo).  Plain-JAX slicing glue."""
    C, N, H, W = x.shape
    if padding > 0:
        x = jnp.pad(x, ((0, 0), (0, 0), (padding, padding), (padding, padding)),
                    constant_values=pad_value)
    Hp, Wp = H + 2 * padding, W + 2 * padding
    eff = dilation * (k - 1) + 1
    Ho = (Hp - eff) // stride + 1
    Wo = (Wp - eff) // stride + 1
    taps = []
    for i in range(k):
        for j in range(k):
            di, dj = i * dilation, j * dilation
            taps.append(x[:, :, di:di + (Ho - 1) * stride + 1:stride,
                          dj:dj + (Wo - 1) * stride + 1:stride])
    return jnp.stack(taps, axis=0), Ho, Wo


@functools.partial(jax.jit, static_argnames=("k", "stride", "padding", "relu_in"))
def conv_bn(x, wT, scale, shift, k=1, stride=1, padding=0, relu_in=False, residual=None):
    """Full conv (channel-major) + BN affine, taps folded into the matmul K.

    x (Cin, N, H, W); wT (Cout, k*k*Cin) with K ordered (tap, cin); out (Cout, N, Ho, Wo).
    The preceding ReLU (when present) is applied in f32 before the bf16 cast, fusing
    into the same XLA convert/copy as the im2col reshape (no extra pass, no bf16 max).
    """
    Cin, N, H, W = x.shape
    Cout = wT.shape[0]
    if relu_in:
        x = jnp.maximum(x, 0.0)
    if k == 1 and padding == 0:
        xs = x[:, :, ::stride, ::stride] if stride > 1 else x
        Ho, Wo = xs.shape[2], xs.shape[3]
        a = xs.reshape(Cin, N * Ho * Wo)
    else:
        taps, Ho, Wo = _extract_patches(x, k, stride, padding)
        a = taps.reshape(k * k * Cin, N * Ho * Wo)
    a = a.astype(jnp.bfloat16)
    res = None if residual is None else residual.reshape(Cout, N * Ho * Wo)
    out = _mm_bn(a, wT, scale, shift, res)
    return out.reshape(Cout, N, Ho, Wo)


@jax.jit
def fact_reduce(x, wbdT, scale, shift, residual=None):
    """FactorizedReduce: ReLU -> [1x1 s2 conv, 1x1 s2 conv on x[:, :, 1:, 1:]] -> concat
    -> BN.  Runs as ONE matmul with a block-diagonal weight over the stacked inputs."""
    Cin, N, H, W = x.shape
    Cout = wbdT.shape[0]
    x = jnp.maximum(x, 0.0)
    a1 = x[:, :, ::2, ::2]
    a2 = x[:, :, 1::2, 1::2]
    Ho, Wo = a1.shape[2], a1.shape[3]
    M = N * Ho * Wo
    a = jnp.concatenate([a1.reshape(Cin, M), a2.reshape(Cin, M)],
                        axis=0).astype(jnp.bfloat16)             # (2*Cin, M)
    res = None if residual is None else residual.reshape(Cout, M)
    out = _mm_bn(a, wbdT, scale, shift, res)
    return out.reshape(Cout, N, Ho, Wo)


@functools.partial(jax.jit,
                   static_argnames=("k", "stride", "padding", "dilation", "relu_in"))
def dwpw_conv(x, dw_w, pwT, scale, shift, k=3, stride=1, padding=1, dilation=1,
              relu_in=True, residual=None):
    """Fused [ReLU ->] depthwise kxk -> pointwise 1x1 -> BN affine [-> + residual]."""
    Cin, N, H, W = x.shape
    Cout = pwT.shape[0]
    taps, Ho, Wo = _extract_patches(x, k, stride, padding, dilation)
    kk = k * k
    M = N * Ho * Wo
    p = taps.reshape(kk, Cin, M)                                  # f32 taps
    Mp, TM = _m_plan(M)
    p = _pad_lanes(p, Mp)
    res = None if residual is None else _pad_lanes(residual.reshape(Cout, M), Mp)
    nM = Mp // TM
    dw3 = dw_w.reshape(kk, Cin, 1).astype(jnp.float32)
    s2 = scale.reshape(Cout, 1).astype(jnp.float32)
    t2 = shift.reshape(Cout, 1).astype(jnp.float32)

    in_specs = [pl.BlockSpec((kk, Cin, TM), lambda i: (0, 0, i)),
                pl.BlockSpec((kk, Cin, 1), lambda i: (0, 0, 0)),
                pl.BlockSpec((Cout, Cin), lambda i: (0, 0)),
                pl.BlockSpec((Cout, 1), lambda i: (0, 0)),
                pl.BlockSpec((Cout, 1), lambda i: (0, 0))]
    args = [p, dw3, pwT.astype(jnp.bfloat16), s2, t2]
    if res is not None:
        in_specs.append(pl.BlockSpec((Cout, TM), lambda i: (0, i)))
        args.append(res)

    out = pl.pallas_call(
        _make_dwpw_kernel(kk, relu_in, res is not None),
        out_shape=jax.ShapeDtypeStruct((Cout, Mp), jnp.float32),
        grid=(nM,),
        in_specs=in_specs,
        out_specs=pl.BlockSpec((Cout, TM), lambda i: (0, i)),
        compiler_params=pltpu.CompilerParams(dimension_semantics=("parallel",)),
    )(*args)
    return out[:, :M].reshape(Cout, N, Ho, Wo)


def _axis_counts(size, n_out, k, stride, padding):
    starts = jnp.arange(n_out) * stride - padding
    idx = starts[:, None] + jnp.arange(k)[None, :]
    return jnp.sum((idx >= 0) & (idx < size), axis=1).astype(jnp.float32)


@functools.partial(jax.jit, static_argnames=("stride",))
def max_pool3(x, stride):
    C, N, H, W = x.shape
    taps, Ho, Wo = _extract_patches(x, 3, stride, 1, pad_value=float("-inf"))
    M = N * Ho * Wo
    p = taps.reshape(9, C, M)
    Mp, TM = _m_plan(M)
    p = _pad_lanes(p, Mp)
    out = pl.pallas_call(
        _make_max_kernel(9),
        out_shape=jax.ShapeDtypeStruct((C, Mp), jnp.float32),
        grid=(Mp // TM,),
        in_specs=[pl.BlockSpec((9, C, TM), lambda i: (0, 0, i))],
        out_specs=pl.BlockSpec((C, TM), lambda i: (0, i)),
        compiler_params=pltpu.CompilerParams(dimension_semantics=("parallel",)),
    )(p)
    return out[:, :M].reshape(C, N, Ho, Wo)


@functools.partial(jax.jit, static_argnames=("stride",))
def avg_pool3(x, stride):
    # AvgPool2d(3, stride, padding=1, count_include_pad=False) (DARTS OPS definition)
    C, N, H, W = x.shape
    taps, Ho, Wo = _extract_patches(x, 3, stride, 1, pad_value=0.0)
    M = N * Ho * Wo
    p = taps.reshape(9, C, M)
    ch = _axis_counts(H, Ho, 3, stride, 1)
    cw = _axis_counts(W, Wo, 3, stride, 1)
    inv = 1.0 / (ch[:, None] * cw[None, :])                       # (Ho, Wo)
    inv = jnp.broadcast_to(inv[None], (N, Ho, Wo)).reshape(1, M)
    Mp, TM = _m_plan(M)
    p = _pad_lanes(p, Mp)
    inv = _pad_lanes(inv, Mp)
    out = pl.pallas_call(
        _make_avg_kernel(9),
        out_shape=jax.ShapeDtypeStruct((C, Mp), jnp.float32),
        grid=(Mp // TM,),
        in_specs=[pl.BlockSpec((9, C, TM), lambda i: (0, 0, i)),
                  pl.BlockSpec((1, TM), lambda i: (0, i))],
        out_specs=pl.BlockSpec((C, TM), lambda i: (0, i)),
        compiler_params=pltpu.CompilerParams(dimension_semantics=("parallel",)),
    )(p, inv)
    return out[:, :M].reshape(C, N, Ho, Wo)


@jax.jit
def add_op(x, y):
    # Fallback only: with this genotype every node add is fused into a conv epilogue.
    shape = x.shape
    C = shape[0]
    M = 1
    for d in shape[1:]:
        M *= d
    x2, y2 = x.reshape(C, M), y.reshape(C, M)
    Mp, TM = _m_plan(M)
    x2, y2 = _pad_lanes(x2, Mp), _pad_lanes(y2, Mp)
    out = pl.pallas_call(
        _add_kernel,
        out_shape=jax.ShapeDtypeStruct((C, Mp), x.dtype),
        grid=(Mp // TM,),
        in_specs=[pl.BlockSpec((C, TM), lambda i: (0, i)),
                  pl.BlockSpec((C, TM), lambda i: (0, i))],
        out_specs=pl.BlockSpec((C, TM), lambda i: (0, i)),
        compiler_params=pltpu.CompilerParams(dimension_semantics=("parallel",)),
    )(x2, y2)
    return out[:, :M].reshape(shape)


@jax.jit
def head_fwd(x, fcT, fcb):
    """nn.AvgPool2d(7) on the (exactly 7x7) final map + Linear, fused in one kernel."""
    C, N, H, W = x.shape
    HW = H * W
    nc = fcT.shape[0]
    x2 = x.reshape(C, N * HW)
    mm = jnp.repeat(jnp.eye(N, dtype=jnp.float32), HW, axis=0) / HW   # (N*HW, N) mean matrix
    b2 = fcb.reshape(nc, 1).astype(jnp.float32)
    out = pl.pallas_call(
        _head_kernel,
        out_shape=jax.ShapeDtypeStruct((nc, N), jnp.float32),
        grid=(1,),
        in_specs=[pl.BlockSpec((C, N * HW), lambda i: (0, 0)),
                  pl.BlockSpec((N * HW, N), lambda i: (0, 0)),
                  pl.BlockSpec((nc, C), lambda i: (0, 0)),
                  pl.BlockSpec((nc, 1), lambda i: (0, 0))],
        out_specs=pl.BlockSpec((nc, N), lambda i: (0, 0)),
        compiler_params=pltpu.CompilerParams(dimension_semantics=("arbitrary",)),
    )(x2, mm, fcT.astype(jnp.bfloat16), b2)
    return out.T                                                      # (N, num_classes)


# ------------------------------ parameter init -------------------------------

class KeyGen:
    def __init__(self, key):
        self.key = key

    def __call__(self):
        self.key, sub = jax.random.split(self.key)
        return sub


def init_bn_fold(kg, c):
    gamma = 1.0 + 0.1 * jax.random.normal(kg(), (c,))
    beta = 0.1 * jax.random.normal(kg(), (c,))
    mean = 0.1 * jax.random.normal(kg(), (c,))
    var = 1.0 + 0.1 * jax.random.uniform(kg(), (c,))
    scale = gamma / jnp.sqrt(var + 1e-5)
    shift = beta - mean * scale
    return scale.astype(jnp.float32), shift.astype(jnp.float32)


def init_conv_wT(kg, k, cin, cout):
    """Full-conv weight in kernel-ready layout (Cout, k*k*cin), K ordered (tap, cin)."""
    fan = k * k * cin
    w = jax.random.normal(kg(), (cout, k * k, cin)) / math.sqrt(fan)
    return w.reshape(cout, k * k * cin).astype(jnp.float32)


def init_dw_w(kg, k, c):
    """Depthwise weight (k*k, c)."""
    return (jax.random.normal(kg(), (k * k, c)) / math.sqrt(k * k)).astype(jnp.float32)


# ------------------------------ DARTS-style ops -------------------------------

def init_relu_conv_bn(kg, cin, cout, k):
    s, t = init_bn_fold(kg, cout)
    return {"wT": init_conv_wT(kg, k, cin, cout), "scale": s, "shift": t, "k": k}


def relu_conv_bn_fwd(p, x, stride=1, padding=0):
    return conv_bn(x, p["wT"], p["scale"], p["shift"],
                   k=p["k"], stride=stride, padding=padding, relu_in=True)


def init_fact_reduce(kg, cin, cout):
    half = cout // 2
    w1 = jax.random.normal(kg(), (half, cin)) / math.sqrt(cin)
    w2 = jax.random.normal(kg(), (half, cin)) / math.sqrt(cin)
    # block-diagonal weight so both 1x1 convs + the channel concat run as ONE matmul
    wbd = jnp.zeros((cout, 2 * cin), jnp.float32)
    wbd = wbd.at[:half, :cin].set(w1).at[half:, cin:].set(w2)
    s, t = init_bn_fold(kg, cout)
    return {"wbdT": wbd, "scale": s, "shift": t}


def fact_reduce_fwd(p, x, residual=None):
    return fact_reduce(x, p["wbdT"], p["scale"], p["shift"], residual)


def init_sep_conv(kg, cin, cout, k):
    s1, t1 = init_bn_fold(kg, cin)
    s2, t2 = init_bn_fold(kg, cout)
    return {"dw1": init_dw_w(kg, k, cin), "pwT1": init_conv_wT(kg, 1, cin, cin),
            "s1": s1, "t1": t1,
            "dw2": init_dw_w(kg, k, cin), "pwT2": init_conv_wT(kg, 1, cin, cout),
            "s2": s2, "t2": t2}


def sep_conv_fwd(p, x, stride, pad, residual=None):
    x = dwpw_conv(x, p["dw1"], p["pwT1"], p["s1"], p["t1"],
                  k=3, stride=stride, padding=pad, dilation=1, relu_in=True)
    x = dwpw_conv(x, p["dw2"], p["pwT2"], p["s2"], p["t2"],
                  k=3, stride=1, padding=pad, dilation=1, relu_in=True, residual=residual)
    return x


def init_dil_conv(kg, cin, cout, k):
    s, t = init_bn_fold(kg, cout)
    return {"dw": init_dw_w(kg, k, cin), "pwT": init_conv_wT(kg, 1, cin, cout),
            "s": s, "t": t}


def dil_conv_fwd(p, x, stride, pad, dil, residual=None):
    return dwpw_conv(x, p["dw"], p["pwT"], p["s"], p["t"],
                     k=3, stride=stride, padding=pad, dilation=dil, relu_in=True,
                     residual=residual)


def init_op(kg, name, C, stride):
    op = {"name": name, "stride": stride}
    if name == "skip_connect":
        if stride != 1:
            op["p"] = init_fact_reduce(kg, C, C)
    elif name == "sep_conv_3x3":
        op["p"] = init_sep_conv(kg, C, C, 3)
    elif name == "dil_conv_3x3":
        op["p"] = init_dil_conv(kg, C, C, 3)
    elif name in ("max_pool_3x3", "avg_pool_3x3"):
        pass
    else:
        raise ValueError(name)
    return op


def _fusable(op):
    """Ops that end in a conv+BN epilogue, into which the node add can be fused."""
    return op["name"] in ("sep_conv_3x3", "dil_conv_3x3") or (
        op["name"] == "skip_connect" and op["stride"] != 1)


def op_fwd(op, x, residual=None):
    name, stride = op["name"], op["stride"]
    if name == "sep_conv_3x3":
        return sep_conv_fwd(op["p"], x, stride, 1, residual)
    if name == "dil_conv_3x3":
        return dil_conv_fwd(op["p"], x, stride, 2, 2, residual)
    if name == "skip_connect":
        if stride != 1:
            return fact_reduce_fwd(op["p"], x, residual)
        out = x
    elif name == "max_pool_3x3":
        out = max_pool3(x, stride=stride)
    elif name == "avg_pool_3x3":
        out = avg_pool3(x, stride=stride)
    else:
        raise ValueError(name)
    if residual is not None:
        out = add_op(out, residual)
    return out


# ------------------------------- Cell & Network --------------------------------

Genotype = namedtuple("Genotype", "normal normal_concat reduce reduce_concat")

GENOTYPE = Genotype(
    normal=[("sep_conv_3x3", 0), ("skip_connect", 1),
            ("max_pool_3x3", 0), ("dil_conv_3x3", 1),
            ("skip_connect", 0), ("sep_conv_3x3", 2),
            ("avg_pool_3x3", 1), ("dil_conv_3x3", 3)],
    normal_concat=[2, 3, 4, 5],
    reduce=[("max_pool_3x3", 0), ("sep_conv_3x3", 1),
            ("skip_connect", 2), ("max_pool_3x3", 1),
            ("avg_pool_3x3", 0), ("skip_connect", 2),
            ("sep_conv_3x3", 3), ("dil_conv_3x3", 1)],
    reduce_concat=[2, 3, 4, 5],
)


def init_cell(kg, genotype, C_pp, C_p, C, reduction, reduction_prev):
    p = {}
    if reduction_prev:
        p["pre0"] = ("fr", init_fact_reduce(kg, C_pp, C))
    else:
        p["pre0"] = ("rcb", init_relu_conv_bn(kg, C_pp, C, 1))
    p["pre1"] = init_relu_conv_bn(kg, C_p, C, 1)
    # model_b Cell: enhancement defaults to False -> always genotype.normal ops.
    op_names, indices = zip(*genotype.normal)
    concat = genotype.normal_concat
    ops = []
    for name, index in zip(op_names, indices):
        stride = 2 if reduction and index < 2 else 1
        ops.append(init_op(kg, name, C, stride))
    p.update(ops=ops, indices=indices, concat=concat,
             steps=len(op_names) // 2, multiplier=len(concat))
    return p


def cell_fwd(p, s0, s1):
    kind, pre0 = p["pre0"]
    s0 = fact_reduce_fwd(pre0, s0) if kind == "fr" else relu_conv_bn_fwd(pre0, s0)
    s1 = relu_conv_bn_fwd(p["pre1"], s1)
    states = [s0, s1]
    for i in range(p["steps"]):
        op1, op2 = p["ops"][2 * i], p["ops"][2 * i + 1]
        x1 = states[p["indices"][2 * i]]
        x2 = states[p["indices"][2 * i + 1]]
        # Fuse the node add (h1 + h2) into whichever branch ends in a conv epilogue.
        if _fusable(op2):
            s = op_fwd(op2, x2, residual=op_fwd(op1, x1))
        elif _fusable(op1):
            s = op_fwd(op1, x1, residual=op_fwd(op2, x2))
        else:
            s = add_op(op_fwd(op1, x1), op_fwd(op2, x2))
        states.append(s)
    return jnp.concatenate([states[i] for i in p["concat"]], axis=0)   # channel-major


def init_network(key, C, num_classes, layers, genotype):
    kg = KeyGen(key)
    params = {}
    s, t = init_bn_fold(kg, C // 2)
    params["stem0a"] = {"wT": init_conv_wT(kg, 3, 3, C // 2), "scale": s, "shift": t}
    s, t = init_bn_fold(kg, C)
    params["stem0b"] = {"wT": init_conv_wT(kg, 3, C // 2, C), "scale": s, "shift": t}
    s, t = init_bn_fold(kg, C)
    params["stem1"] = {"wT": init_conv_wT(kg, 3, C, C), "scale": s, "shift": t}

    C_pp, C_p, C_curr = C, C, C
    cells = []
    reduction_prev = True
    for i in range(layers):
        if i in [layers // 3, 2 * layers // 3]:
            C_curr *= 2
            reduction = True
        else:
            reduction = False
        cell = init_cell(kg, genotype, C_pp, C_p, C_curr, reduction, reduction_prev)
        reduction_prev = reduction
        cells.append(cell)
        C_pp, C_p = C_p, cell["multiplier"] * C_curr
    params["cells"] = cells
    params["fcT"] = (jax.random.normal(kg(), (num_classes, C_p)) /
                     math.sqrt(C_p)).astype(jnp.float32)
    params["fcb"] = jnp.zeros((num_classes,), jnp.float32)
    return params


def network_fwd(params, x_nchw):
    # NCHW -> channel-major (C, N, H, W) once; all Pallas work is channel-major.
    x = jnp.transpose(x_nchw, (1, 0, 2, 3)).astype(jnp.float32)

    # stem0: conv(3->C/2,s2)+BN, ReLU, conv(C/2->C,s2)+BN   (ReLU fused into 2nd conv)
    s0 = conv_bn(x, params["stem0a"]["wT"], params["stem0a"]["scale"],
                 params["stem0a"]["shift"], k=3, stride=2, padding=1)
    s0 = conv_bn(s0, params["stem0b"]["wT"], params["stem0b"]["scale"],
                 params["stem0b"]["shift"], k=3, stride=2, padding=1, relu_in=True)
    # stem1: ReLU, conv(C->C,s2)+BN   (ReLU fused)
    s1 = conv_bn(s0, params["stem1"]["wT"], params["stem1"]["scale"],
                 params["stem1"]["shift"], k=3, stride=2, padding=1, relu_in=True)

    for cell in params["cells"]:
        s0, s1 = s1, cell_fwd(cell, s0, s1)

    logits = head_fwd(s1, params["fcT"], params["fcb"])   # AvgPool2d(7) + Linear fused
    logits_aux = None  # auxiliary=False / eval mode
    return logits, logits_aux


# ----------------------------------- main --------------------------------------

if __name__ == "__main__":
    # Small channel count (C=8 vs 48 in the paper), 3 layers, but 224x224 input so
    # that AvgPool2d(7) sees exactly a 7x7 feature map (as the module requires).
    C, NUM_CLASSES, LAYERS = 8, 10, 3

    params = init_network(jax.random.PRNGKey(1), C, NUM_CLASSES, LAYERS, GENOTYPE)

    x = jax.random.normal(jax.random.PRNGKey(0), (2, 3, 224, 224), jnp.float32)  # NCHW
    logits, logits_aux = network_fwd(params, x)
    logits = jax.block_until_ready(logits)
    assert logits.shape == (2, NUM_CLASSES)
    assert logits_aux is None
    print("KERNEL_OK")
</pallas_src>

<mosaic_0001>
module attributes {stable_mosaic.version = 11 : i64} {
  func.func @kernel(%arg0: i32, %arg1: memref<27x2048xbf16, #tpu.memory_space<vmem>>, %arg2: memref<4x27xbf16, #tpu.memory_space<vmem>>, %arg3: memref<4x1xf32, #tpu.memory_space<vmem>>, %arg4: memref<4x1xf32, #tpu.memory_space<vmem>>, %arg5: memref<4x2048xf32, #tpu.memory_space<vmem>>) attributes {dimension_semantics = [#tpu.dimension_semantics<parallel>], iteration_bounds = array<i64: 13>, scalar_prefetch = 0 : i64, scratch_operands = 0 : i64, tpu.core_type = #tpu.core_type<tc>, window_params = [{transform_indices = @transform_0, window_bounds = array<i64: 27, 2048>}, {pipeline_mode = #tpu.pipeline_mode<synchronous>, transform_indices = @transform_1, window_bounds = array<i64: 4, 27>}, {pipeline_mode = #tpu.pipeline_mode<synchronous>, transform_indices = @transform_2, window_bounds = array<i64: 4, 1>}, {pipeline_mode = #tpu.pipeline_mode<synchronous>, transform_indices = @transform_3, window_bounds = array<i64: 4, 1>}, {transform_indices = @transform_4, window_bounds = array<i64: 4, 2048>}]} {
    %c0 = arith.constant 0 : index
    %c0_0 = arith.constant 0 : index
    %0 = vector.load %arg2[%c0, %c0_0] : memref<4x27xbf16, #tpu.memory_space<vmem>>, vector<4x27xbf16>
    %c0_1 = arith.constant 0 : index
    %c0_2 = arith.constant 0 : index
    %1 = vector.load %arg1[%c0_1, %c0_2] : memref<27x2048xbf16, #tpu.memory_space<vmem>>, vector<27x2048xbf16>
    %cst = arith.constant dense<0.000000e+00> : vector<4x2048xf32>
    %2 = tpu.matmul %0, %1, %cst {dimension_numbers = #tpu.dot_dimension_numbers<[1], [0], [0], [1], [0, 0, 1, 1], [], []>} : vector<4x27xbf16>, vector<27x2048xbf16>, vector<4x2048xf32> -> vector<4x2048xf32>
    %c0_3 = arith.constant 0 : index
    %c0_4 = arith.constant 0 : index
    %3 = vector.load %arg3[%c0_3, %c0_4] : memref<4x1xf32, #tpu.memory_space<vmem>>, vector<4x1xf32>
    %4 = vector.broadcast %3 : vector<4x1xf32> to vector<4x2048xf32>
    %5 = arith.mulf %2, %4 : vector<4x2048xf32>
    %c0_5 = arith.constant 0 : index
    %c0_6 = arith.constant 0 : index
    %6 = vector.load %arg4[%c0_5, %c0_6] : memref<4x1xf32, #tpu.memory_space<vmem>>, vector<4x1xf32>
    %7 = vector.broadcast %6 : vector<4x1xf32> to vector<4x2048xf32>
    %8 = arith.addf %5, %7 : vector<4x2048xf32>
    %c0_7 = arith.constant 0 : index
    %c0_8 = arith.constant 0 : index
    %9 = vector.load %arg5[%c0_7, %c0_8] : memref<4x2048xf32, #tpu.memory_space<vmem>>, vector<4x2048xf32>
    tpu.vector_store %arg5[%c0_7, %c0_8], %8 {strides = array<i32>} : memref<4x2048xf32, #tpu.memory_space<vmem>>, vector<4x2048xf32>,
    return
  }
  func.func @transform_0(%arg0: i32) -> (i32, i32) {
    %c0_i32 = arith.constant 0 : i32
    %c0_i32_0 = arith.constant 0 : i32
    return %c0_i32, %arg0 : i32, i32
  }
  func.func @transform_1(%arg0: i32) -> (i32, i32) {
    %c0_i32 = arith.constant 0 : i32
    %c0_i32_0 = arith.constant 0 : i32
    %c0_i32_1 = arith.constant 0 : i32
    return %c0_i32, %c0_i32_0 : i32, i32
  }
  func.func @transform_2(%arg0: i32) -> (i32, i32) {
    %c0_i32 = arith.constant 0 : i32
    %c0_i32_0 = arith.constant 0 : i32
    %c0_i32_1 = arith.constant 0 : i32
    return %c0_i32, %c0_i32_0 : i32, i32
  }
  func.func @transform_3(%arg0: i32) -> (i32, i32) {
    %c0_i32 = arith.constant 0 : i32
    %c0_i32_0 = arith.constant 0 : i32
    %c0_i32_1 = arith.constant 0 : i32
    return %c0_i32, %c0_i32_0 : i32, i32
  }
  func.func @transform_4(%arg0: i32) -> (i32, i32) {
    %c0_i32 = arith.constant 0 : i32
    %c0_i32_0 = arith.constant 0 : i32
    return %c0_i32, %arg0 : i32, i32
  }
}

</mosaic_0001>

<bundles_post_ra>
// kernel: conv_bn.1
= control target key start
LH: loop header
LB: loop body
LE: loop exit
PB: predicated region body
PF: predicated region fallthrough
CT: control target
= control target key end

     0   :  { %s1122_s15 = smov 0   ;;  %s1124_s16 = smov 0   ;;  %s1377_s0 = inlined_call_operand.vmem [shape: bf16[27,26624], index: 0, kind: input, shape index: {}]   ;;  %s1378_s1 = inlined_call_operand.vmem [shape: bf16[4,27], index: 1, kind: input, shape index: {}]   ;;  %s1379_s2 = inlined_call_operand.vmem [shape: f32[4,1], index: 2, kind: input, shape index: {}]   ;;  %s1380_s3 = inlined_call_operand.vmem [shape: f32[4,1], index: 3, kind: input, shape index: {}]   ;;  %s1381_s4 = inlined_call_operand.vmem [shape: f32[4,26624], index: 4, kind: output, shape index: {}]  }
   0x1   :  { %s1126_s17 = smov 0  }
   0x2 LB: > { %s990_s18 = sadd.s32 4294967295, %s1093_s17   ;;  %s1139_s19 = sadd.s32 1, %s1093_s17   ;;  %s1093_s17 = sphi %s1126_s17, %s1384_s17   ;;  %s1089_s16 = sphi %s1124_s16, %s1383_s16   ;;  %s1085_s15 = sphi %s1122_s15, %s1382_s15  }
   0x3   : > { %s18_s20 = ssub.s32 %s1093_s17, %s1139_s19  ;;  %s21_s21 = sadd.s32 1, %s1089_s16 }
   0x4   : > { %p19_p0 = scmp.eq.s32.totalorder %s18_s20, 0  ;;  %p28_p1 = scmp.ne.s32.totalorder %s1089_s16, %s1085_s15 }
   0x5   : > { %p29_p2 = scmp.eq.s32.totalorder %s1093_s17, 0  ;;  %p993_p4 = scmp.ge.s32.totalorder %s1093_s17, 13 }
   0x6   : > { %s1148_s22 = scalar_select %p19_p0, %s1089_s16, %s21_s21  }
   0x7   : > { %p30_p3 = por %p29_p2, %p28_p1  ;;  %152 = sbr.rel (%p993_p4) target bundleno = 34 (0x22), region = 28 }
   0xe   : > { %155 = sbr.rel (!%p30_p3) target bundleno = 34 (0x22), region = 32  ;;  %s157_s23 = sand.u32 (%p30_p3), 1, %s1089_s16  }
   0xf   : > { %s1043_s24 = sshll.u32 (%p30_p3), %s1093_s17, 6  ;;  %s994_s25 = sshll.u32 (%p30_p3), %s157_s23, 8 }
  0x10   : > { %s1156_s28 = scalar_lea.vmem (%p30_p3), %s1377_s0, %s1043_s24  ;;  %s1161_s29 = scalar_lea.vmem (%p30_p3), [#allocation2], %s994_s25 }
  0x11   : > { %v175_v0 = vld [vmem:[%s1156_s28] sm:$0xff] (%p30_p3)  ;;  %v177_v1 = vld [vmem:[%s1156_s28 + $0x8] sm:$0xff] (%p30_p3)  ;;  %v179_v2 = vld [vmem:[%s1156_s28 + $0x10] sm:$0xff] (%p30_p3) }
  0x12   : > { %176 = vst [vmem:[%s1161_s29] sm:$0xff] (%p30_p3), %v175_v0  ;;  %178 = vst [vmem:[%s1161_s29 + $0x8] sm:$0xff] (%p30_p3), %v177_v1  ;;  %v181_v3 = vld [vmem:[%s1156_s28 + $0x18] sm:$0xff] (%p30_p3)  ;;  %v183_v4 = vld [vmem:[%s1156_s28 + $0x20] sm:$0xff] (%p30_p3) }
  0x13   : > { %180 = vst [vmem:[%s1161_s29 + $0x10] sm:$0xff] (%p30_p3), %v179_v2  ;;  %v185_v5 = vld [vmem:[%s1156_s28 + $0x28] sm:$0xff] (%p30_p3)  ;;  %182 = vst [vmem:[%s1161_s29 + $0x18] sm:$0xff] (%p30_p3), %v181_v3  ;;  %v187_v6 = vld [vmem:[%s1156_s28 + $0x30] sm:$0xff] (%p30_p3) }
  0x14   : > { %184 = vst [vmem:[%s1161_s29 + $0x20] sm:$0xff] (%p30_p3), %v183_v4  ;;  %186 = vst [vmem:[%s1161_s29 + $0x28] sm:$0xff] (%p30_p3), %v185_v5  ;;  %v189_v7 = vld [vmem:[%s1156_s28 + $0x38] sm:$0xff] (%p30_p3)  ;;  %v191_v8 = vld [vmem:[%s1156_s28 + $0x340] sm:$0xff] (%p30_p3) }
  0x15   : > { %188 = vst [vmem:[%s1161_s29 + $0x30] sm:$0xff] %v187_v6  ;;  %190 = vst [vmem:[%s1161_s29 + $0x38] sm:$0xff] %v189_v7  ;;  %v193_v9 = vld [vmem:[%s1156_s28 + $0x348] sm:$0xff]  ;;  %v195_v10 = vld [vmem:[%s1156_s28 + $0x350] sm:$0xff] }
  0x16   : > { %192 = vst [vmem:[%s1161_s29 + $0x40] sm:$0xff] %v191_v8  ;;  %v197_v11 = vld [vmem:[%s1156_s28 + $0x358] sm:$0xff]  ;;  %194 = vst [vmem:[%s1161_s29 + $0x48] sm:$0xff] %v193_v9  ;;  %v199_v12 = vld [vmem:[%s1156_s28 + $0x360] sm:$0xff] }
  0x17   : > { %196 = vst [vmem:[%s1161_s29 + $0x50] sm:$0xff] %v195_v10  ;;  %198 = vst [vmem:[%s1161_s29 + $0x58] sm:$0xff] %v197_v11  ;;  %v201_v13 = vld [vmem:[%s1156_s28 + $0x368] sm:$0xff]  ;;  %v203_v14 = vld [vmem:[%s1156_s28 + $0x370] sm:$0xff] }
  0x18   : > { %200 = vst [vmem:[%s1161_s29 + $0x60] sm:$0xff] %v199_v12  ;;  %202 = vst [vmem:[%s1161_s29 + $0x68] sm:$0xff] %v201_v13  ;;  %v205_v15 = vld [vmem:[%s1156_s28 + $0x378] sm:$0xff]  ;;  %v207_v16 = vld [vmem:[%s1156_s28 + $0x680] sm:$0xff] }
  0x19   : > { %204 = vst [vmem:[%s1161_s29 + $0x70] sm:$0xff] %v203_v14  ;;  %v209_v17 = vld [vmem:[%s1156_s28 + $0x688] sm:$0xff]  ;;  %206 = vst [vmem:[%s1161_s29 + $0x78] sm:$0xff] %v205_v15  ;;  %v211_v18 = vld [vmem:[%s1156_s28 + $0x690] sm:$0xff] }
  0x1a   : > { %208 = vst [vmem:[%s1161_s29 + $0x80] sm:$0xff] %v207_v16  ;;  %210 = vst [vmem:[%s1161_s29 + $0x88] sm:$0xff] %v209_v17  ;;  %v213_v19 = vld [vmem:[%s1156_s28 + $0x698] sm:$0xff]  ;;  %v215_v20 = vld [vmem:[%s1156_s28 + $0x6a0] sm:$0xff] }
  0x1b   : > { %212 = vst [vmem:[%s1161_s29 + $0x90] sm:$0xff] %v211_v18  ;;  %214 = vst [vmem:[%s1161_s29 + $0x98] sm:$0xff] %v213_v19  ;;  %v217_v21 = vld [vmem:[%s1156_s28 + $0x6a8] sm:$0xff]  ;;  %v219_v22 = vld [vmem:[%s1156_s28 + $0x6b0] sm:$0xff] }
  0x1c   : > { %216 = vst [vmem:[%s1161_s29 + $0xa0] sm:$0xff] %v215_v20  ;;  %v221_v23 = vld [vmem:[%s1156_s28 + $0x6b8] sm:$0xff]  ;;  %218 = vst [vmem:[%s1161_s29 + $0xa8] sm:$0xff] %v217_v21  ;;  %v223_v24 = vld [vmem:[%s1156_s28 + $0x9c0] sm:$0xff] }
  0x1d   : > { %220 = vst [vmem:[%s1161_s29 + $0xb0] sm:$0xff] %v219_v22  ;;  %222 = vst [vmem:[%s1161_s29 + $0xb8] sm:$0xff] %v221_v23  ;;  %v225_v25 = vld [vmem:[%s1156_s28 + $0x9c8] sm:$0xff]  ;;  %v227_v26 = vld [vmem:[%s1156_s28 + $0x9d0] sm:$0xff] }
  0x1e   : > { %224 = vst [vmem:[%s1161_s29 + $0xc0] sm:$0xff] %v223_v24  ;;  %226 = vst [vmem:[%s1161_s29 + $0xc8] sm:$0xff] %v225_v25  ;;  %v229_v27 = vld [vmem:[%s1156_s28 + $0x9d8] sm:$0xff]  ;;  %v231_v28 = vld [vmem:[%s1156_s28 + $0x9e0] sm:$0xff] }
  0x1f   : > { %228 = vst [vmem:[%s1161_s29 + $0xd0] sm:$0xff] %v227_v26  ;;  %v233_v29 = vld [vmem:[%s1156_s28 + $0x9e8] sm:$0xff]  ;;  %230 = vst [vmem:[%s1161_s29 + $0xd8] sm:$0xff] %v229_v27  ;;  %v235_v30 = vld [vmem:[%s1156_s28 + $0x9f0] sm:$0xff] }
  0x20   : > { %232 = vst [vmem:[%s1161_s29 + $0xe0] sm:$0xff] %v231_v28  ;;  %234 = vst [vmem:[%s1161_s29 + $0xe8] sm:$0xff] %v233_v29  ;;  %v237_v31 = vld [vmem:[%s1156_s28 + $0x9f8] sm:$0xff] }
  0x21   : > { %236 = vst [vmem:[%s1161_s29 + $0xf0] sm:$0xff] %v235_v30  ;;  %238 = vst [vmem:[%s1161_s29 + $0xf8] sm:$0xff] %v237_v31 }
  0x22 PF: > { %p997_p5 = scmp.ge.s32.totalorder %s1093_s17, 1  ;;  %p243_p6 = scmp.lt.s32.totalorder %s1093_s17, 14 }
  0x24   : > { %p244_p7 = pnand %p997_p5, %p243_p6 }
  0x25   : > { %s250_s30 = sand.u32 (!%p244_p7), 1, %s1085_s15   ;;  %vm464_vm0 = vcmask (!%p244_p7), 1044480   ;;  %vm465_vm1 = vcmask (!%p244_p7), 1045504   ;;  %v1095_v32 = vmov (!%p244_p7), 65535   ;;  %v1096_v34 = vmov (!%p244_p7), 0   ;;  %s999_s13 = sshll.u32 (!%p244_p7), %s990_s18, 4 }
  0x26   : > { %247 = sbr.rel (%p244_p7) target bundleno = 297 (0x129), region = 55  ;;  %s998_s5 = sshll.u32 (!%p244_p7), %s250_s30, 8  ;;  %v466_v33 = vsel (!%p244_p7), %vm464_vm0, 4294967295, %v1095_v32  ;;  %548 = vmatprep.mubr.bf16.mxu0 (!%p244_p7), %v1096_v34  ;;  %589 = vmatprep.mubr.bf16.mxu1 (!%p244_p7), %v1096_v34  ;;  %v844_v35 = vld [vmem:[%s1379_s2] sm:$0xf] (!%p244_p7)  ;;  %vm460_vm2 = vcmask (!%p244_p7), 220160  }
  0x27   : > { %1070 = vset.pattern.permute.xlu0 (!%p244_p7), %v1096_v34  ;;  %s1233_s8 = scalar_lea.vmem (!%p244_p7), [#allocation2], %s998_s5  ;;  %v1242_v44 = vsel (!%p244_p7), %vm465_vm1, %v466_v33, 0  ;;  %v1261_v5 = vld [vmem:[%s1378_s1] sm:$0x3] (!%p244_p7)  ;;  %p277_p8 = scmp.lt.s32.totalorder (!%p244_p7), %s999_s13, 207 }
  0x28   : > { %v284_v36 = vld [vmem:[%s1233_s8] sm:$0xff] (!%p244_p7)  ;;  %v285_v38 = vld [vmem:[%s1233_s8 + $0x8] sm:$0xff] (!%p244_p7)  ;;  %847 = vperm.xlu0 (!%p244_p7), %1070, %v844_v35   ;;  %v286_v51 = vld [vmem:[%s1233_s8 + $0x10] sm:$0xff] (!%p244_p7) }
  0x29   : > { %v292_v37 = vld [vmem:[%s1233_s8 + $0x40] sm:$0xff] (!%p244_p7)  ;;  %v293_v40 = vld [vmem:[%s1233_s8 + $0x48] sm:$0xff] (!%p244_p7)  ;;  %v294_v54 = vld [vmem:[%s1233_s8 + $0x50] sm:$0xff] (!%p244_p7) }
  0x2a   : > { %v1002_v39 = vcombine.high (!%p244_p7), %v284_v36, %v292_v37  ;;  %v1001_v41 = vcombine.low (!%p244_p7), %v284_v36, %v292_v37  ;;  %v300_v42 = vld [vmem:[%s1233_s8 + $0x80] sm:$0xff] (!%p244_p7)  ;;  %v1004_v45 = vcombine.high (!%p244_p7), %v285_v38, %v293_v40  ;;  %v1003_v46 = vcombine.low (!%p244_p7), %v285_v38, %v293_v40  ;;  %v301_v48 = vld [vmem:[%s1233_s8 + $0x88] sm:$0xff] (!%p244_p7)  ;;  %v287_v55 = vld [vmem:[%s1233_s8 + $0x18] sm:$0xff] (!%p244_p7) }
  0x2b   : > { %v308_v43 = vld [vmem:[%s1233_s8 + $0xc0] sm:$0x33] (!%p244_p7)  ;;  %v309_v49 = vld [vmem:[%s1233_s8 + $0xc8] sm:$0x33] (!%p244_p7)  ;;  %v295_v56 = vld [vmem:[%s1233_s8 + $0x58] sm:$0xff] (!%p244_p7)  ;;  %v1006_v0 = vcombine.high (!%p244_p7), %v286_v51, %v294_v54  ;;  %v1005_v6 = vcombine.low (!%p244_p7), %v286_v51, %v294_v54 }
  0x2c   : > { %v1018_v47 = vcombine.high (!%p244_p7), %v300_v42, %v308_v43  ;;  %v1017_v50 = vcombine.low (!%p244_p7), %v300_v42, %v308_v43  ;;  %516 = vmatprep.subr.bf16.mxu0 (!%p244_p7), %v1002_v39  ;;  %v1020_v52 = vcombine.high (!%p244_p7), %v301_v48, %v309_v49  ;;  %v1019_v53 = vcombine.low (!%p244_p7), %v301_v48, %v309_v49  ;;  %v302_v59 = vld [vmem:[%s1233_s8 + $0x90] sm:$0xff] (!%p244_p7)  ;;  %v303_v61 = vld [vmem:[%s1233_s8 + $0x98] sm:$0xff] (!%p244_p7)  ;;  %v288_v11 = vld [vmem:[%s1233_s8 + $0x20] sm:$0xff] (!%p244_p7) }
  0x2d   : > { %557 = vmatprep.subr.bf16.mxu1 %v1004_v45  ;;  %517 = vmatpush1.bf16.msra.mxu0 %v1001_v41  ;;  %v310_v60 = vld [vmem:[%s1233_s8 + $0xd0] sm:$0x33]  ;;  %v311_v1 = vld [vmem:[%s1233_s8 + $0xd8] sm:$0x33]  ;;  %v1008_v2 = vcombine.high %v287_v55, %v295_v56  ;;  %v1007_v8 = vcombine.low %v287_v55, %v295_v56  ;;  %v296_v12 = vld [vmem:[%s1233_s8 + $0x60] sm:$0xff]  ;;  %s1386_s13 = smov (!%p277_p8, %s999_s13), 207 }
  0x2e   : > { %v472_v57 = vand.u32 %v1018_v47, %v1242_v44  ;;  %v469_v58 = vand.u32 %v1017_v50, %v1242_v44  ;;  %558 = vmatpush1.bf16.msra.mxu1 %v1003_v46  ;;  %v478_v62 = vand.u32 %v1020_v52, %v1242_v44  ;;  %v475_v63 = vand.u32 %v1019_v53, %v1242_v44  ;;  %v289_v14 = vld [vmem:[%s1233_s8 + $0x28] sm:$0xff]  ;;  %v304_v15 = vld [vmem:[%s1233_s8 + $0xa0] sm:$0xff]  ;;  %v290_v32 = vld [vmem:[%s1233_s8 + $0x30] sm:$0xff]  ;;  %s1000_s14 = sshll.u32 %s1386_s13, 2 }
  0x2f   : > { %v1022_v3 = vcombine.high %v302_v59, %v310_v60  ;;  %v1024_v4 = vcombine.high %v303_v61, %v311_v1  ;;  %v1021_v7 = vcombine.low %v302_v59, %v310_v60  ;;  %v1023_v10 = vcombine.low %v303_v61, %v311_v1  ;;  %v312_v16 = vld [vmem:[%s1233_s8 + $0xe0] sm:$0x33]  ;;  %v297_v17 = vld [vmem:[%s1233_s8 + $0x68] sm:$0xff]  ;;  %v298_v33 = vld [vmem:[%s1233_s8 + $0x70] sm:$0xff]  ;;  %s1332_s18 = scalar_lea.vmem %s1381_s4, %s1000_s14 }
  0x30   : > { %518 = vmatprep.subr.bf16.mxu0 %v472_v57  ;;  %559 = vmatprep.subr.bf16.mxu1 %v478_v62  ;;  %v305_v18 = vld [vmem:[%s1233_s8 + $0xa8] sm:$0xff]  ;;  %v866_v21 = vld [vmem:[%s1380_s3] sm:$0xf]  ;;  %v1010_v23 = vcombine.high %v288_v11, %v296_v12  ;;  %v1026_v24 = vcombine.high %v304_v15, %v312_v16  ;;  %v1012_v25 = vcombine.high %v289_v14, %v297_v17  ;;  %v291_v36 = vld [vmem:[%s1233_s8 + $0x38] sm:$0xff] }
  0x31   : > { %519 = vmatpush1.bf16.msra.mxu0 %v469_v58  ;;  %v484_v9 = vand.u32 %v1022_v3, %v1242_v44  ;;  %v490_v13 = vand.u32 %v1024_v4, %v1242_v44  ;;  %v313_v19 = vld [vmem:[%s1233_s8 + $0xe8] sm:$0x33]  ;;  %v481_v20 = vand.u32 %v1021_v7, %v1242_v44  ;;  %v487_v22 = vand.u32 %v1023_v10, %v1242_v44  ;;  %v306_v37 = vld [vmem:[%s1233_s8 + $0xb0] sm:$0xff]  ;;  %v299_v39 = vld [vmem:[%s1233_s8 + $0x78] sm:$0xff] }
  0x32   : > { %560 = vmatpush1.bf16.msra.mxu1 %v475_v63  ;;  %598 = vmatprep.subr.bf16.mxu0 %v1006_v0  ;;  %v1028_v26 = vcombine.high %v305_v18, %v313_v19  ;;  %v1009_v27 = vcombine.low %v288_v11, %v296_v12  ;;  %v1025_v28 = vcombine.low %v304_v15, %v312_v16  ;;  %v314_v38 = vld [vmem:[%s1233_s8 + $0xf0] sm:$0x33]  ;;  %v307_v40 = vld [vmem:[%s1233_s8 + $0xb8] sm:$0xff] }
  0x33   : > { %639 = vmatprep.subr.bf16.mxu1 %v1008_v2  ;;  %869 = vperm.xlu0 %1070, %v866_v21   ;;  %v1011_v29 = vcombine.low %v289_v14, %v297_v17  ;;  %v496_v30 = vand.u32 %v1026_v24, %v1242_v44  ;;  %v1027_v31 = vcombine.low %v305_v18, %v313_v19  ;;  %v315_v41 = vld [vmem:[%s1233_s8 + $0xf8] sm:$0x33] }
  0x34   : > { %1033 = vmatmul.mubr.msk.bf16.vlgmr.msra.gmra.mrb[0].mxu0 %vm460_vm2, %v1261_v5  ;;  %v502_v35 = vand.u32 %v1028_v26, %v1242_v44  ;;  %v493_v42 = vand.u32 %v1025_v28, %v1242_v44  ;;  %v1014_v45 = vcombine.high %v290_v32, %v298_v33  ;;  %v1030_v46 = vcombine.high %v306_v37, %v314_v38 }
  0x35   : > { %1034 = vmatmul.mubr.msk.bf16.vlgmr.msra.gmra.mrb[0].mxu1 %vm460_vm2, %v1261_v5  ;;  %599 = vmatpush1.bf16.msra.mxu0 %v1005_v6  ;;  %v499_v43 = vand.u32 %v1027_v31, %v1242_v44  ;;  %v1016_v47 = vcombine.high %v291_v36, %v299_v39  ;;  %v1032_v48 = vcombine.high %v307_v40, %v315_v41 }
  0x36   : > { %640 = vmatpush1.bf16.msra.mxu1 %v1007_v8  ;;  %600 = vmatprep.subr.bf16.mxu0 %v484_v9  ;;  %v1013_v49 = vcombine.low %v290_v32, %v298_v33  ;;  %v1029_v50 = vcombine.low %v306_v37, %v314_v38  ;;  %v1015_v51 = vcombine.low %v291_v36, %v299_v39 }
  0x37   : > { %641 = vmatprep.subr.bf16.mxu1 %v490_v13  ;;  %630 = vmatprep.mubr.bf16.mxu0 %v1096_v34  ;;  %v508_v52 = vand.u32 %v1030_v46, %v1242_v44  ;;  %v1031_v53 = vcombine.low %v307_v40, %v315_v41  ;;  %v514_v54 = vand.u32 %v1032_v48, %v1242_v44 }
  0x38   : > { %671 = vmatprep.mubr.bf16.mxu1 %v1096_v34  ;;  %v505_v55 = vand.u32 %v1029_v50, %v1242_v44 }
  0x39   : > { %601 = vmatpush1.bf16.msra.mxu0 %v481_v20  ;;  %v511_v56 = vand.u32 %v1031_v53, %v1242_v44 }
  0x3a   : > { %642 = vmatpush1.bf16.msra.mxu1 %v487_v22  ;;  %680 = vmatprep.subr.bf16.mxu0 %v1010_v23 }
  0x3b   : > { %721 = vmatprep.subr.bf16.mxu1 %v1012_v25 }
  0x3c   : > { %1035 = vmatmul.mubr.msk.bf16.vlgmr.msra.gmra.mrb[4].mxu0 %vm460_vm2, %v1261_v5 }
  0x3d   : > { %1036 = vmatmul.mubr.msk.bf16.vlgmr.msra.gmra.mrb[4].mxu1 %vm460_vm2, %v1261_v5  ;;  %681 = vmatpush1.bf16.msra.mxu0 %v1009_v27 }
  0x3e   : > { %722 = vmatpush1.bf16.msra.mxu1 %v1011_v29  ;;  %682 = vmatprep.subr.bf16.mxu0 %v496_v30 }
  0x3f   : > { %723 = vmatprep.subr.bf16.mxu1 %v502_v35  ;;  %712 = vmatprep.mubr.bf16.mxu0 %v1096_v34 }
  0x40   : > { %753 = vmatprep.mubr.bf16.mxu1 %v1096_v34 }
  0x41   : > { %683 = vmatpush1.bf16.msra.mxu0 %v493_v42 }
  0x42   : > { %724 = vmatpush1.bf16.msra.mxu1 %v499_v43  ;;  %762 = vmatprep.subr.bf16.mxu0 %v1014_v45 }
  0x43   : > { %803 = vmatprep.subr.bf16.mxu1 %v1016_v47 }
  0x44   : > { %1037 = vmatmul.mubr.msk.bf16.vlgmr.msra.gmra.mrb[8].mxu0 %vm460_vm2, %v1261_v5 }
  0x45   : > { %1038 = vmatmul.mubr.msk.bf16.vlgmr.msra.gmra.mrb[8].mxu1 %vm460_vm2, %v1261_v5  ;;  %763 = vmatpush1.bf16.msra.mxu0 %v1013_v49 }
  0x46   : > { %804 = vmatpush1.bf16.msra.mxu1 %v1015_v51  ;;  %764 = vmatprep.subr.bf16.mxu0 %v508_v52 }
  0x47   : > { %805 = vmatprep.subr.bf16.mxu1 %v514_v54  ;;  %794 = vmatprep.mubr.bf16.mxu0 %v1096_v34 }
  0x48   : > { %835 = vmatprep.mubr.bf16.mxu1 %v1096_v34 }
  0x49   : > { %765 = vmatpush1.bf16.msra.mxu0 %v505_v55 }
  0x4a   : > { %806 = vmatpush1.bf16.msra.mxu1 %v511_v56 }
  0x4c   : > { %1039 = vmatmul.mubr.msk.bf16.vlgmr.msra.gmra.mrb[12].mxu0 %vm460_vm2, %v1261_v5 }
  0x4d   : > { %1040 = vmatmul.mubr.msk.bf16.vlgmr.msra.gmra.mrb[12].mxu1 %vm460_vm2, %v1261_v5 }
  0xa7   : > { %v1318_v57 = vpop.permute.xlu0 %847 }
  0xb2   : > { %v1320_v58 = vpop.permute.xlu0 %869 }
 0x107   : > { %v550_v44 = vpop.f32.mrb[0].mxu0 }
 0x108   : > { %v850_v59 = vmul.f32 %v1318_v57, %v550_v44  ;;  %v591_v34 = vpop.f32.mrb[0].mxu1  ;;  %v552_v60 = vpop.f32.mrb[1].mxu0 }
 0x109   : > { %v852_v61 = vmul.f32 %v1318_v57, %v591_v34  ;;  %v851_v62 = vmul.f32 %v1318_v57, %v552_v60  ;;  %v593_v63 = vpop.f32.mrb[1].mxu1  ;;  %v554_v0 = vpop.f32.mrb[2].mxu0 }
 0x10a   : > { %v853_v1 = vmul.f32 %v1318_v57, %v593_v63  ;;  %v595_v2 = vpop.f32.mrb[2].mxu1  ;;  %v555_v3 = vpop.f32.mrb[3].mxu0  ;;  %v872_v4 = vadd.f32 %v1320_v58, %v850_v59 }
 0x10b   : > { %v596_v5 = vpop.f32.mrb[3].mxu1  ;;  %v873_v6 = vadd.f32 %v1320_v58, %v851_v62  ;;  %v874_v7 = vadd.f32 %v1320_v58, %v852_v61 }
 0x10c   : > { %v875_v8 = vadd.f32 %v1320_v58, %v853_v1 }
 0x10d   : > { %v904_v9 = vcombine.low %v872_v4, %v873_v6 }
 0x10e   : > { %v905_v10 = vcombine.low %v874_v7, %v875_v8 }
 0x10f   : > { %v632_v11 = vpop.f32.mrb[4].mxu0  ;;  %920 = vst [vmem:[%s1332_s18] sm:$0xff] %v904_v9 }
 0x110   : > { %v854_v12 = vmul.f32 %v1318_v57, %v632_v11  ;;  %v673_v13 = vpop.f32.mrb[4].mxu1  ;;  %v634_v14 = vpop.f32.mrb[5].mxu0  ;;  %921 = vst [vmem:[%s1332_s18 + $0x8] sm:$0xff] %v905_v10 }
 0x111   : > { %v856_v15 = vmul.f32 %v1318_v57, %v673_v13  ;;  %v855_v16 = vmul.f32 %v1318_v57, %v634_v14  ;;  %v675_v17 = vpop.f32.mrb[5].mxu1  ;;  %v636_v18 = vpop.f32.mrb[6].mxu0 }
 0x112   : > { %v876_v19 = vadd.f32 %v1320_v58, %v854_v12  ;;  %v857_v20 = vmul.f32 %v1318_v57, %v675_v17  ;;  %v677_v21 = vpop.f32.mrb[6].mxu1  ;;  %v637_v22 = vpop.f32.mrb[7].mxu0 }
 0x113   : > { %v878_v23 = vadd.f32 %v1320_v58, %v856_v15  ;;  %v877_v24 = vadd.f32 %v1320_v58, %v855_v16  ;;  %v678_v25 = vpop.f32.mrb[7].mxu1 }
 0x114   : > { %v879_v26 = vadd.f32 %v1320_v58, %v857_v20 }
 0x115   : > { %v906_v27 = vcombine.low %v876_v19, %v877_v24 }
 0x116   : > { %v907_v28 = vcombine.low %v878_v23, %v879_v26 }
 0x117   : > { %922 = vst [vmem:[%s1332_s18 + $0x10] sm:$0xff] %v906_v27  ;;  %v714_v29 = vpop.f32.mrb[8].mxu0 }
 0x118   : > { %923 = vst [vmem:[%s1332_s18 + $0x18] sm:$0xff] %v907_v28  ;;  %v858_v30 = vmul.f32 %v1318_v57, %v714_v29  ;;  %v755_v31 = vpop.f32.mrb[8].mxu1  ;;  %v716_v32 = vpop.f32.mrb[9].mxu0 }
 0x119   : > { %v860_v33 = vmul.f32 %v1318_v57, %v755_v31  ;;  %v859_v35 = vmul.f32 %v1318_v57, %v716_v32  ;;  %v757_v36 = vpop.f32.mrb[9].mxu1  ;;  %v718_v37 = vpop.f32.mrb[10].mxu0 }
 0x11a   : > { %v880_v38 = vadd.f32 %v1320_v58, %v858_v30  ;;  %v861_v39 = vmul.f32 %v1318_v57, %v757_v36  ;;  %v759_v40 = vpop.f32.mrb[10].mxu1  ;;  %v719_v41 = vpop.f32.mrb[11].mxu0 }
 0x11b   : > { %v882_v42 = vadd.f32 %v1320_v58, %v860_v33  ;;  %v881_v43 = vadd.f32 %v1320_v58, %v859_v35  ;;  %v760_v45 = vpop.f32.mrb[11].mxu1 }
 0x11c   : > { %v883_v46 = vadd.f32 %v1320_v58, %v861_v39 }
 0x11d   : > { %v908_v47 = vcombine.low %v880_v38, %v881_v43 }
 0x11e   : > { %v909_v48 = vcombine.low %v882_v42, %v883_v46 }
 0x11f   : > { %924 = vst [vmem:[%s1332_s18 + $0x20] sm:$0xff] %v908_v47  ;;  %v796_v49 = vpop.f32.mrb[12].mxu0 }
 0x120   : > { %925 = vst [vmem:[%s1332_s18 + $0x28] sm:$0xff] %v909_v48  ;;  %v862_v50 = vmul.f32 %v1318_v57, %v796_v49  ;;  %v837_v51 = vpop.f32.mrb[12].mxu1  ;;  %v798_v52 = vpop.f32.mrb[13].mxu0 }
 0x121   : > { %v864_v53 = vmul.f32 %v1318_v57, %v837_v51  ;;  %v863_v54 = vmul.f32 %v1318_v57, %v798_v52  ;;  %v839_v55 = vpop.f32.mrb[13].mxu1  ;;  %v800_v56 = vpop.f32.mrb[14].mxu0 }
 0x122   : > { %v884_v44 = vadd.f32 %v1320_v58, %v862_v50  ;;  %v865_v59 = vmul.f32 %v1318_v57, %v839_v55  ;;  %v841_v34 = vpop.f32.mrb[14].mxu1  ;;  %v801_v60 = vpop.f32.mrb[15].mxu0 }
 0x123   : > { %v886_v61 = vadd.f32 %v1320_v58, %v864_v53  ;;  %v885_v62 = vadd.f32 %v1320_v58, %v863_v54  ;;  %v842_v63 = vpop.f32.mrb[15].mxu1 }
 0x124   : > { %v887_v0 = vadd.f32 %v1320_v58, %v865_v59 }
 0x125   : > { %v910_v1 = vcombine.low %v884_v44, %v885_v62 }
 0x126   : > { %v911_v2 = vcombine.low %v886_v61, %v887_v0 }
 0x127   : > { %926 = vst [vmem:[%s1332_s18 + $0x30] sm:$0xff] %v910_v1 }
 0x128   : > { %927 = vst [vmem:[%s1332_s18 + $0x38] sm:$0xff] %v911_v2 }
 0x129 PF: > { %p11_p9 = scmp.ge.s32.totalorder %s1139_s19, 15   ;;  %s1382_s15 = smov %s1089_s16 }
 0x12a   : > { %s1383_s16 = smov %s1148_s22  ;;  %s1384_s17 = smov %s1139_s19 }
 0x12b   :  { %13 = sbr.rel (!%p11_p9) target bundleno = 2 (0x2), region = 94 }

</bundles_post_ra>
